<compile_context>
chip_gen: v7x
topology: tpu7x:2x2x1
jax: 0.10.0
libtpu: 0.0.40
codegen_flags: <defaults>
</compile_context>

<pallas_src>
import jax
import jax.numpy as jnp
from jax.experimental import pallas as pl
from jax.experimental.pallas import tpu as pltpu

EPS = 1e-5  # PyTorch BatchNorm default eps


def _round_up(a, m):
    return ((a + m - 1) // m) * m


def _vmem():
    return pl.BlockSpec(memory_space=pltpu.MemorySpace.VMEM)


# ----------------------------------------------------------------------------
# Kernel 1: conv as im2col matmul (bn0/bias/bn1 pre-folded into W', b') + relu
#   patches tile: (TM, 9)   W': (9, 32)   b': (1, 32)   out tile: (TM, 32)
# (32-wide output stores are masked/partial-lane; accepted because this kernel
#  is tiny and the layout lets us skip the NCHW transpose entirely.)
# ----------------------------------------------------------------------------
def conv_relu_kernel(p_ref, w_ref, b_ref, o_ref):
    y = jnp.dot(p_ref[...], w_ref[...], preferred_element_type=jnp.float32)
    o_ref[...] = jnp.maximum(y + b_ref[...], 0.0)


# ----------------------------------------------------------------------------
# Kernel 2: fc (+ folded bn2) + relu, computed once: x = relu(h @ W_fc' + b')
#   h: (B, hidden) f32   W_fc': (hidden, dim) bf16   out: (B, dim) f32
# ----------------------------------------------------------------------------
def fc_relu_kernel(h_ref, w_ref, b_ref, x_ref):
    y = jnp.dot(h_ref[...].astype(jnp.bfloat16), w_ref[...],
                preferred_element_type=jnp.float32)
    x_ref[...] = jnp.maximum(y + b_ref[...], 0.0)


# ----------------------------------------------------------------------------
# Kernel 3: entity scores, gridded over entity tiles of width TN (mult of 128)
#   x: (B, dim) bf16 (resident)   et tile: (dim, TN) bf16   b tile: (1, TN)
# ----------------------------------------------------------------------------
def score_kernel(x_ref, et_ref, b_ref, o_ref):
    s = jnp.dot(x_ref[...], et_ref[...], preferred_element_type=jnp.float32)
    o_ref[...] = jax.nn.sigmoid(s + b_ref[...])


# ----------------------------------------------------------------------------
# Wrapper (glue: embedding gather, im2col, weight folding, padding)
# ----------------------------------------------------------------------------
def conve_forward(batch, params, emb_dim1, emb_dim2, *, tn=2048):
    ent_w = params["ent_w"]                      # (num_ent, dim)
    rel_w = params["rel_w"]                      # (num_rel*2, dim)
    num_ent, dim = ent_w.shape

    hs = batch[:, 0]
    rs = batch[:, 1]
    e1 = ent_w[hs].reshape(-1, 1, emb_dim1, emb_dim2)      # NCHW
    rel = rel_w[rs].reshape(-1, 1, emb_dim1, emb_dim2)     # NCHW
    stacked = jnp.concatenate([e1, rel], axis=2)           # (B, 1, 2*d1, d2)

    B = stacked.shape[0]
    H, W = 2 * emb_dim1, emb_dim2
    Ho, Wo = H - 2, W - 2
    hidden = 32 * Ho * Wo
    img = stacked[:, 0]                                    # (B, H, W)

    # im2col: (B, Ho, Wo, 9), last axis ordered (kh outer, kw inner).
    cols = jnp.stack(
        [img[:, i:i + Ho, j:j + Wo] for i in range(3) for j in range(3)],
        axis=-1)
    patches = cols.reshape(B * Ho * Wo, 9).astype(jnp.float32)

    # ---- Fold bn0 + conv bias + bn1 into W' (9,32) and b' (1,32) ----
    g0, be0, rm0, rv0 = params["bn0"]
    scale0 = g0 * jax.lax.rsqrt(rv0 + EPS)                 # scalar
    shift0 = be0 - rm0 * scale0
    g1, b1, rm1, rv1 = params["bn1"]                       # (32,)
    s1 = g1 * jax.lax.rsqrt(rv1 + EPS)
    t1 = b1 - rm1 * s1

    w = params["conv_w"].reshape(32, 9)                    # (Cout, kh*3+kw)
    wmat = (w.T * (scale0 * s1)[None, :]).astype(jnp.float32)      # (9, 32)
    bvec = (s1 * (shift0 * w.sum(axis=1) + params["conv_b"]) + t1)
    bvec = bvec.reshape(1, 32).astype(jnp.float32)

    # ---- Kernel 1: conv+relu, gridded over patch rows ----
    Np = B * Ho * Wo
    tm = min(512, _round_up(Np, 8))
    np_pad = _round_up(Np, tm)
    patches_p = jnp.pad(patches, ((0, np_pad - Np), (0, 0)))

    conv_out = pl.pallas_call(
        conv_relu_kernel,
        out_shape=jax.ShapeDtypeStruct((np_pad, 32), jnp.float32),
        grid=(np_pad // tm,),
        in_specs=[pl.BlockSpec((tm, 9), lambda i: (i, 0)),
                  pl.BlockSpec((9, 32), lambda i: (0, 0)),
                  pl.BlockSpec((1, 32), lambda i: (0, 0))],
        out_specs=pl.BlockSpec((tm, 32), lambda i: (i, 0)),
        compiler_params=pltpu.CompilerParams(
            dimension_semantics=("parallel",)),
    )(patches_p, wmat, bvec)

    # Row-major reshape (no NCHW transpose needed: the permutation is folded
    # into fc_w's columns below).  h[b, p*32 + c] with p = i*Wo + j.
    h = conv_out[:Np].reshape(B, hidden)

    # ---- Fold bn2 into fc weight/bias; permute fc_w cols to our flatten ----
    g2, b2, rm2, rv2 = params["bn2"]                       # (dim,)
    s2 = g2 * jax.lax.rsqrt(rv2 + EPS)
    t2 = b2 - rm2 * s2

    fcw = params["fc_w"]                                   # (dim, hidden) NCHW cols
    fcw_perm = fcw.reshape(dim, 32, Ho * Wo).transpose(0, 2, 1).reshape(dim, hidden)
    fcw_t = (fcw_perm.T * s2[None, :]).astype(jnp.bfloat16)        # (hidden, dim)
    fcb = (params["fc_b"] * s2 + t2).reshape(1, dim).astype(jnp.float32)

    # ---- Kernel 2: fc + relu -> x (B, dim), computed once ----
    # (B, hidden, dim are small; whole-array VMEM residency is fine here.)
    x = pl.pallas_call(
        fc_relu_kernel,
        out_shape=jax.ShapeDtypeStruct((B, dim), jnp.float32),
        in_specs=[_vmem(), _vmem(), _vmem()],
        out_specs=_vmem(),
    )(h, fcw_t, fcb)
    x_b16 = x.astype(jnp.bfloat16)

    # ---- Kernel 3: score matmul over entity tiles ----
    tn_eff = min(_round_up(tn, 128), _round_up(num_ent, 128))
    n_pad = _round_up(num_ent, tn_eff)
    et = ent_w.T.astype(jnp.bfloat16)                      # (dim, num_ent)
    et_p = jnp.pad(et, ((0, 0), (0, n_pad - num_ent)))
    b_p = jnp.pad(params["b"].astype(jnp.float32),
                  (0, n_pad - num_ent)).reshape(1, n_pad)

    out = pl.pallas_call(
        score_kernel,
        out_shape=jax.ShapeDtypeStruct((B, n_pad), jnp.float32),
        grid=(n_pad // tn_eff,),
        in_specs=[pl.BlockSpec((B, dim), lambda j: (0, 0)),       # resident
                  pl.BlockSpec((dim, tn_eff), lambda j: (0, j)),  # streamed
                  pl.BlockSpec((1, tn_eff), lambda j: (0, j))],   # streamed
        out_specs=pl.BlockSpec((B, tn_eff), lambda j: (0, j)),
        compiler_params=pltpu.CompilerParams(
            dimension_semantics=("parallel",),
            vmem_limit_bytes=32 * 1024 * 1024),
    )(x_b16, et_p, b_p)

    return out[:, :num_ent]


# ----------------------------------------------------------------------------
# Deterministic parameter construction (shapes per ConvE.__init__)
# ----------------------------------------------------------------------------
def make_params(key, num_ent, num_rel, dim, emb_dim1):
    emb_dim2 = dim // emb_dim1
    hidden_size = 32 * (2 * emb_dim1 - 2) * (emb_dim2 - 2)
    ks = jax.random.split(key, 6)

    def xavier_uniform(k, shape):
        fan_out, fan_in = shape
        bound = jnp.sqrt(6.0 / (fan_in + fan_out))
        return jax.random.uniform(k, shape, jnp.float32, -bound, bound)

    params = {
        "ent_w": xavier_uniform(ks[0], (num_ent, dim)),
        "rel_w": xavier_uniform(ks[1], (num_rel * 2, dim)),
        "conv_w": 0.1 * jax.random.normal(ks[2], (32, 1, 3, 3), jnp.float32),
        "conv_b": 0.01 * jax.random.normal(ks[3], (32,), jnp.float32),
        "fc_w": 0.05 * jax.random.normal(ks[4], (dim, hidden_size), jnp.float32),
        "fc_b": 0.01 * jax.random.normal(ks[5], (dim,), jnp.float32),
        "b": jnp.zeros((num_ent,), jnp.float32),
        # BatchNorm params: (gamma, beta, running_mean, running_var) — defaults
        "bn0": (jnp.float32(1.0), jnp.float32(0.0),
                jnp.float32(0.0), jnp.float32(1.0)),
        "bn1": (jnp.ones((32,), jnp.float32), jnp.zeros((32,), jnp.float32),
                jnp.zeros((32,), jnp.float32), jnp.ones((32,), jnp.float32)),
        "bn2": (jnp.ones((dim,), jnp.float32), jnp.zeros((dim,), jnp.float32),
                jnp.zeros((dim,), jnp.float32), jnp.ones((dim,), jnp.float32)),
    }
    return params, emb_dim2, hidden_size


if __name__ == "__main__":
    # Small, self-consistent configuration:
    #   args.dim = 32, args.embedding_shape1 = 8  -> emb_dim2 = 4
    #   stacked input (B, 1, 16, 4) -> conv out (B, 32, 14, 2) -> hidden = 896
    # num_ent = 400 with tn=128 exercises a 4-tile entity grid.
    num_ent, num_rel = 400, 8
    dim, emb_dim1 = 32, 8

    key = jax.random.PRNGKey(0)
    params, emb_dim2, hidden_size = make_params(key, num_ent, num_rel, dim, emb_dim1)

    # batch of (head, relation, tail) triples, shape (B, 3)
    batch = jnp.array([[3, 5, 10],
                       [7, 2, 1],
                       [123, 11, 57]], dtype=jnp.int32)

    preds = conve_forward(batch, params, emb_dim1, emb_dim2, tn=128)
    preds = jax.block_until_ready(preds)

    assert preds.shape == (batch.shape[0], num_ent)
    assert preds.dtype == jnp.float32
    assert bool(jnp.all((preds >= 0.0) & (preds <= 1.0)))
    print("KERNEL_OK")
</pallas_src>

<mosaic_0001>
module attributes {stable_mosaic.version = 11 : i64} {
  func.func @conv_relu_kernel(%arg0: i32, %arg1: memref<88x9xf32, #tpu.memory_space<vmem>>, %arg2: memref<9x32xf32, #tpu.memory_space<vmem>>, %arg3: memref<1x32xf32, #tpu.memory_space<vmem>>, %arg4: memref<88x32xf32, #tpu.memory_space<vmem>>) attributes {dimension_semantics = [#tpu.dimension_semantics<parallel>], iteration_bounds = array<i64: 1>, scalar_prefetch = 0 : i64, scratch_operands = 0 : i64, tpu.core_type = #tpu.core_type<tc>, window_params = [{transform_indices = @transform_0, window_bounds = array<i64: 88, 9>}, {pipeline_mode = #tpu.pipeline_mode<synchronous>, transform_indices = @transform_1, window_bounds = array<i64: 9, 32>}, {pipeline_mode = #tpu.pipeline_mode<synchronous>, transform_indices = @transform_2, window_bounds = array<i64: 1, 32>}, {transform_indices = @transform_3, window_bounds = array<i64: 88, 32>}]} {
    %c0 = arith.constant 0 : index
    %c0_0 = arith.constant 0 : index
    %0 = vector.load %arg1[%c0, %c0_0] : memref<88x9xf32, #tpu.memory_space<vmem>>, vector<88x9xf32>
    %c0_1 = arith.constant 0 : index
    %c0_2 = arith.constant 0 : index
    %1 = vector.load %arg2[%c0_1, %c0_2] : memref<9x32xf32, #tpu.memory_space<vmem>>, vector<9x32xf32>
    %cst = arith.constant dense<0.000000e+00> : vector<88x32xf32>
    %2 = tpu.matmul %0, %1, %cst {dimension_numbers = #tpu.dot_dimension_numbers<[1], [0], [0], [1], [0, 0, 1, 1], [], []>} : vector<88x9xf32>, vector<9x32xf32>, vector<88x32xf32> -> vector<88x32xf32>
    %c0_3 = arith.constant 0 : index
    %c0_4 = arith.constant 0 : index
    %3 = vector.load %arg3[%c0_3, %c0_4] : memref<1x32xf32, #tpu.memory_space<vmem>>, vector<1x32xf32>
    %4 = vector.broadcast %3 : vector<1x32xf32> to vector<88x32xf32>
    %5 = arith.addf %2, %4 : vector<88x32xf32>
    %cst_5 = arith.constant 0.000000e+00 : f32
    %6 = vector.broadcast %cst_5 : f32 to vector<88x32xf32>
    %7 = arith.maximumf %5, %6 : vector<88x32xf32>
    %c0_6 = arith.constant 0 : index
    %c0_7 = arith.constant 0 : index
    %8 = vector.load %arg4[%c0_6, %c0_7] : memref<88x32xf32, #tpu.memory_space<vmem>>, vector<88x32xf32>
    tpu.vector_store %arg4[%c0_6, %c0_7], %7 {strides = array<i32>} : memref<88x32xf32, #tpu.memory_space<vmem>>, vector<88x32xf32>,
    return
  }
  func.func @transform_0(%arg0: i32) -> (i32, i32) {
    %c0_i32 = arith.constant 0 : i32
    %c0_i32_0 = arith.constant 0 : i32
    return %arg0, %c0_i32 : i32, i32
  }
  func.func @transform_1(%arg0: i32) -> (i32, i32) {
    %c0_i32 = arith.constant 0 : i32
    %c0_i32_0 = arith.constant 0 : i32
    %c0_i32_1 = arith.constant 0 : i32
    return %c0_i32, %c0_i32_0 : i32, i32
  }
  func.func @transform_2(%arg0: i32) -> (i32, i32) {
    %c0_i32 = arith.constant 0 : i32
    %c0_i32_0 = arith.constant 0 : i32
    %c0_i32_1 = arith.constant 0 : i32
    return %c0_i32, %c0_i32_0 : i32, i32
  }
  func.func @transform_3(%arg0: i32) -> (i32, i32) {
    %c0_i32 = arith.constant 0 : i32
    %c0_i32_0 = arith.constant 0 : i32
    return %arg0, %c0_i32 : i32, i32
  }
}

</mosaic_0001>

<bundles_post_ra>
// kernel: tpu_custom_call.1
= control target key start
LH: loop header
LB: loop body
LE: loop exit
PB: predicated region body
PF: predicated region fallthrough
CT: control target
= control target key end

     0   :  { %vm68_vm0 = vcmask 1040384   ;;  %v292_v0 = vmov 0.0|0.0   ;;  %vm293_vm1 = vmmov 1   ;;  %vm294_vm3 = vmmov 0   ;;  %s424_s1 = inlined_call_operand.vmem [shape: f32[9,32], index: 1, kind: input, shape index: {}]   ;;  %s425_s0 = inlined_call_operand.vmem [shape: f32[88,9], index: 0, kind: input, shape index: {}]   ;;  %s426_s2 = inlined_call_operand.vmem [shape: f32[1,32], index: 2, kind: input, shape index: {}]   ;;  %s427_s3 = inlined_call_operand.vmem [shape: f32[88,32], index: 3, kind: output, shape index: {}]  }
   0x1   :  { %282 = vmatprep.subr.bf16.mxu0 %v292_v0  ;;  %v25_v1 = vld [vmem:[%s424_s1] sm:$0xff]  ;;  %v26_v2 = vld [vmem:[%s424_s1 + $0x8] sm:$0x1]  ;;  %vm284_vm2 = vmpackc.low %vm68_vm0, %vm293_vm1  ;;  %286 = vmatprep.subr.bf16.mxu1 %v292_v0  ;;  %v295_v4 = vmov 0.0   ;;  %vm34_vm4 = vcmask 72704   ;;  %vm203_vm5 = vcmask 261120  }
   0x2   :  { %v283_v3 = vpack.c.bf16 %v26_v2, %v25_v1  ;;  %249 = vmatprep.mubr.msk.f32.mxu0 %vm294_vm3, %v295_v4  ;;  %267 = vmatprep.mubr.msk.f32.mxu1 %vm294_vm3, %v295_v4  ;;  %v14_v5 = vld [vmem:[%s425_s0] sm:$0xff]  ;;  %v20_v6 = vld [vmem:[%s425_s0 + $0x30] sm:$0xff]  ;;  %v15_v7 = vld [vmem:[%s425_s0 + $0x8] sm:$0xff] }
   0x3   :  { %v21_v8 = vld [vmem:[%s425_s0 + $0x38] sm:$0xff]  ;;  %v16_v9 = vld [vmem:[%s425_s0 + $0x10] sm:$0xff]  ;;  %v22_v10 = vld [vmem:[%s425_s0 + $0x40] sm:$0xff] }
   0x4   :  { %285 = vmatpush3.bf16.msk.msra.mxu0 %vm284_vm2, %v283_v3  ;;  %287 = vmatpush3.bf16.msk.msra.mxu1 %vm284_vm2, %v283_v3  ;;  %v17_v11 = vld [vmem:[%s425_s0 + $0x18] sm:$0xff]  ;;  %v23_v12 = vld [vmem:[%s425_s0 + $0x48] sm:$0xff]  ;;  %v18_v13 = vld [vmem:[%s425_s0 + $0x20] sm:$0xff] }
   0x5   :  { %v24_v14 = vld [vmem:[%s425_s0 + $0x50] sm:$0xff]  ;;  %v19_v15 = vld [vmem:[%s425_s0 + $0x28] sm:$0xff]  ;;  %v219_v16 = vld [vmem:[%s426_s2] ss:$0 sm:$0xff] }
   0x7   :  { %250 = vmatmul.mubr.msk.f32.vlgmr.msra.gmra.mrb[0].mxu0 %vm34_vm4, %v14_v5  ;;  %268 = vmatmul.mubr.msk.f32.vlgmr.msra.gmra.mrb[0].mxu1 %vm34_vm4, %v20_v6 }
   0x8   :  { %252 = vmatprep.mubr.msk.f32.mxu0 %vm294_vm3, %v295_v4  ;;  %270 = vmatprep.mubr.msk.f32.mxu1 %vm294_vm3, %v295_v4 }
   0xb   :  { %253 = vmatmul.mubr.msk.f32.gmra.mrb[2].mxu0 %vm34_vm4, %v15_v7  ;;  %271 = vmatmul.mubr.msk.f32.gmra.mrb[2].mxu1 %vm34_vm4, %v21_v8 }
   0xc   :  { %255 = vmatprep.mubr.msk.f32.mxu0 %vm294_vm3, %v295_v4  ;;  %273 = vmatprep.mubr.msk.f32.mxu1 %vm294_vm3, %v295_v4 }
   0xf   :  { %256 = vmatmul.mubr.msk.f32.gmra.mrb[4].mxu0 %vm34_vm4, %v16_v9  ;;  %274 = vmatmul.mubr.msk.f32.gmra.mrb[4].mxu1 %vm34_vm4, %v22_v10 }
  0x10   :  { %258 = vmatprep.mubr.msk.f32.mxu0 %vm294_vm3, %v295_v4  ;;  %276 = vmatprep.mubr.msk.f32.mxu1 %vm294_vm3, %v295_v4 }
  0x13   :  { %259 = vmatmul.mubr.msk.f32.gmra.mrb[6].mxu0 %vm34_vm4, %v17_v11  ;;  %277 = vmatmul.mubr.msk.f32.gmra.mrb[6].mxu1 %vm34_vm4, %v23_v12 }
  0x14   :  { %261 = vmatprep.mubr.msk.f32.mxu0 %vm294_vm3, %v295_v4  ;;  %279 = vmatprep.mubr.msk.f32.mxu1 %vm294_vm3, %v295_v4 }
  0x17   :  { %262 = vmatmul.mubr.msk.f32.gmra.mrb[8].mxu0 %vm34_vm4, %v18_v13  ;;  %280 = vmatmul.mubr.msk.f32.gmra.mrb[8].mxu1 %vm34_vm4, %v24_v14 }
  0x18   :  { %264 = vmatprep.mubr.msk.f32.mxu0 %vm294_vm3, %v295_v4 }
  0x1b   :  { %265 = vmatmul.mubr.msk.f32.gmra.mrb[10].mxu0 %vm34_vm4, %v19_v15 }
  0xda   :  { %v138_v17 = vpop.f32.mrb[0].mxu0  ;;  %v168_v18 = vpop.f32.mrb[0].mxu1 }
  0xdb   :  { %v139_v19 = vadd.f32 %v219_v16, %v138_v17  ;;  %v251_v20 = vpop.f32.mrb[1].mxu0  ;;  %v169_v21 = vadd.f32 %v219_v16, %v168_v18  ;;  %v269_v22 = vpop.f32.mrb[1].mxu1 }
  0xdd   :  { %v192_v23 = vmax.f32 %v139_v19, 0.0  ;;  %v198_v24 = vmax.f32 %v169_v21, 0.0 }
  0xde   :  { %v143_v25 = vpop.f32.mrb[2].mxu0  ;;  %v173_v26 = vpop.f32.mrb[2].mxu1 }
  0xdf   :  { %204 = vst.msk [vmem:[%s427_s3] sm:$0xff] %vm203_vm5, %v192_v23  ;;  %210 = vst.msk [vmem:[%s427_s3 + $0x30] sm:$0xff] %vm203_vm5, %v198_v24  ;;  %v144_v27 = vadd.f32 %v219_v16, %v143_v25  ;;  %v254_v28 = vpop.f32.mrb[3].mxu0  ;;  %v174_v29 = vadd.f32 %v219_v16, %v173_v26  ;;  %v272_v30 = vpop.f32.mrb[3].mxu1 }
  0xe1   :  { %v193_v31 = vmax.f32 %v144_v27, 0.0  ;;  %v199_v32 = vmax.f32 %v174_v29, 0.0 }
  0xe2   :  { %v148_v33 = vpop.f32.mrb[4].mxu0  ;;  %v178_v34 = vpop.f32.mrb[4].mxu1 }
  0xe3   :  { %205 = vst.msk [vmem:[%s427_s3 + $0x8] sm:$0xff] %vm203_vm5, %v193_v31  ;;  %211 = vst.msk [vmem:[%s427_s3 + $0x38] sm:$0xff] %vm203_vm5, %v199_v32  ;;  %v149_v35 = vadd.f32 %v219_v16, %v148_v33  ;;  %v257_v36 = vpop.f32.mrb[5].mxu0  ;;  %v179_v37 = vadd.f32 %v219_v16, %v178_v34  ;;  %v275_v38 = vpop.f32.mrb[5].mxu1 }
  0xe5   :  { %v194_v39 = vmax.f32 %v149_v35, 0.0  ;;  %v200_v40 = vmax.f32 %v179_v37, 0.0 }
  0xe6   :  { %v153_v41 = vpop.f32.mrb[6].mxu0  ;;  %v183_v42 = vpop.f32.mrb[6].mxu1 }
  0xe7   :  { %206 = vst.msk [vmem:[%s427_s3 + $0x10] sm:$0xff] %vm203_vm5, %v194_v39  ;;  %212 = vst.msk [vmem:[%s427_s3 + $0x40] sm:$0xff] %vm203_vm5, %v200_v40  ;;  %v154_v43 = vadd.f32 %v219_v16, %v153_v41  ;;  %v260_v44 = vpop.f32.mrb[7].mxu0  ;;  %v184_v45 = vadd.f32 %v219_v16, %v183_v42  ;;  %v278_v46 = vpop.f32.mrb[7].mxu1 }
  0xe9   :  { %v195_v47 = vmax.f32 %v154_v43, 0.0  ;;  %v201_v48 = vmax.f32 %v184_v45, 0.0 }
  0xea   :  { %v158_v49 = vpop.f32.mrb[8].mxu0  ;;  %v188_v50 = vpop.f32.mrb[8].mxu1 }
  0xeb   :  { %207 = vst.msk [vmem:[%s427_s3 + $0x18] sm:$0xff] %vm203_vm5, %v195_v47  ;;  %213 = vst.msk [vmem:[%s427_s3 + $0x48] sm:$0xff] %vm203_vm5, %v201_v48  ;;  %v159_v51 = vadd.f32 %v219_v16, %v158_v49  ;;  %v263_v52 = vpop.f32.mrb[9].mxu0  ;;  %v189_v53 = vadd.f32 %v219_v16, %v188_v50  ;;  %v281_v54 = vpop.f32.mrb[9].mxu1 }
  0xed   :  { %v196_v55 = vmax.f32 %v159_v51, 0.0  ;;  %v202_v56 = vmax.f32 %v189_v53, 0.0 }
  0xee   :  { %v163_v57 = vpop.f32.mrb[10].mxu0 }
  0xef   :  { %208 = vst.msk [vmem:[%s427_s3 + $0x20] sm:$0xff] %vm203_vm5, %v196_v55  ;;  %214 = vst.msk [vmem:[%s427_s3 + $0x50] sm:$0xff] %vm203_vm5, %v202_v56  ;;  %v164_v58 = vadd.f32 %v219_v16, %v163_v57  ;;  %v266_v59 = vpop.f32.mrb[11].mxu0 }
  0xf1   :  { %v197_v60 = vmax.f32 %v164_v58, 0.0 }
  0xf3   :  { %209 = vst.msk [vmem:[%s427_s3 + $0x28] sm:$0xff] %vm203_vm5, %v197_v60 }

</bundles_post_ra>
